<compile_context>
chip_gen: v7x
topology: tpu7x:2x2x1
jax: 0.10.0
libtpu: 0.0.40
codegen_flags: <defaults>
</compile_context>

<pallas_src>
import functools

import jax
import jax.numpy as jnp
from jax.experimental import pallas as pl
from jax.experimental.pallas import tpu as pltpu


_LANE = 128
_TK_CAP = 8192  # max K tile (columns per grid step)


def _cdiv(a: int, b: int) -> int:
    return -(-a // b)


def _vmem_budget_and_limit():
    """Per-generation VMEM working-set budget and scoped-VMEM limit (bytes)."""
    cap = None
    try:
        cap = getattr(pltpu.get_tpu_info(), "vmem_capacity_bytes", None)
    except Exception:
        cap = None
    if cap is not None and cap >= 100 * 1024 * 1024:
        # v5e / v6e: 128 MiB physical VMEM -> be generous.
        return 72 * 1024 * 1024, 96 * 1024 * 1024
    # v7x (64 MiB physical) or unknown generation: stay conservative.
    return 40 * 1024 * 1024, 48 * 1024 * 1024


def _pick_tk(kdim: int, per_tk_bytes: int, fixed_bytes: int, budget: int) -> int:
    """Pick a K tile (multiple of 128) under the VMEM budget.

    Prefers a divisor of the 128-padded K (no ragged tile); otherwise uses the cap and
    the kernel masks the ragged last tile.
    """
    k128 = _cdiv(kdim, _LANE) * _LANE
    avail = max(budget - fixed_bytes, per_tk_bytes * _LANE)
    cap = max(_LANE, min(_TK_CAP, (avail // per_tk_bytes) // _LANE * _LANE))
    if k128 <= cap:
        return k128
    best = _LANE
    t = _LANE
    while t <= cap:
        if k128 % t == 0:
            best = t
        t += _LANE
    return best if 2 * best >= cap else cap


def _fits_single(m: int, elt_in: int, budget: int) -> bool:
    """Can we keep the full (m, m) f32 output resident and still afford tk >= 512?"""
    out_bytes = 3 * m * m * 4                 # resident f32 out (x2 buf) + dot temp
    per_tk = m * (2 * elt_in + 2)             # double-buffered native input + bf16 temp
    return out_bytes + per_tk * 512 <= budget


def _mask_k(x, k, tk, kdim):
    """Zero out columns beyond the true K extent (ragged last tile contents are garbage)."""
    col = jax.lax.broadcasted_iota(jnp.int32, x.shape, dimension=1)
    return jnp.where(k * tk + col < kdim, x, jnp.zeros_like(x))


def _gram_kernel_single(x_ref, o_ref, *, inv_n, kdim, tk, compute_dtype, ragged):
    # x_ref: (M, tk) feature tile in the input's NATIVE dtype for the current K step.
    # o_ref: (M, M) f32 output block, resident across the K grid axis (accumulator).
    k = pl.program_id(0)

    @pl.when(k == 0)
    def _():
        o_ref[...] = jnp.zeros_like(o_ref)

    x = x_ref[...]
    if ragged:
        x = _mask_k(x, k, tk, kdim)
    x = x.astype(compute_dtype)  # VPU cast, nearly free; avoids an extra HBM pass
    # X_tile @ X_tile^T on the MXU; f32 accumulation.
    o_ref[...] += jax.lax.dot_general(
        x, x,
        dimension_numbers=(((1,), (1,)), ((), ())),
        preferred_element_type=jnp.float32,
    )

    @pl.when(k == pl.num_programs(0) - 1)
    def _():
        o_ref[...] = o_ref[...] * inv_n


def _gram_kernel_tiled(xi_ref, xj_ref, o_ref, *, inv_n, kdim, tk, compute_dtype, ragged):
    # xi_ref: (tm, tk) row block; xj_ref: (tn, tk) column block; o_ref: (tm, tn) f32
    # output tile, resident across the innermost K grid axis.
    k = pl.program_id(2)

    @pl.when(k == 0)
    def _():
        o_ref[...] = jnp.zeros_like(o_ref)

    xi = xi_ref[...]
    xj = xj_ref[...]
    if ragged:
        xi = _mask_k(xi, k, tk, kdim)
        xj = _mask_k(xj, k, tk, kdim)
    o_ref[...] += jax.lax.dot_general(
        xi.astype(compute_dtype), xj.astype(compute_dtype),
        dimension_numbers=(((1,), (1,)), ((), ())),
        preferred_element_type=jnp.float32,
    )

    @pl.when(k == pl.num_programs(2) - 1)
    def _():
        o_ref[...] = o_ref[...] * inv_n


def gram(x_nchw: jax.Array, *, compute_dtype=jnp.bfloat16) -> jax.Array:
    a, b, c, d = x_nchw.shape
    m = a * b
    kdim = c * d
    out_dtype = x_nchw.dtype
    inv_n = 1.0 / float(a * b * c * d)
    elt_in = jnp.dtype(x_nchw.dtype).itemsize

    budget, vmem_limit = _vmem_budget_and_limit()

    # Plain reshape only — cast / K-padding handled inside the kernel.
    feat = x_nchw.reshape(m, kdim)

    if _fits_single(m, elt_in, budget):
        # Single-grid path: full (m, m) f32 accumulator resident, K innermost (only) axis.
        tk = _pick_tk(kdim, m * (2 * elt_in + 2), 3 * m * m * 4, budget)
        n_k = _cdiv(kdim, tk)
        ragged = (kdim % tk) != 0
        kernel = functools.partial(
            _gram_kernel_single, inv_n=inv_n, kdim=kdim, tk=tk,
            compute_dtype=compute_dtype, ragged=ragged)
        out = pl.pallas_call(
            kernel,
            out_shape=jax.ShapeDtypeStruct((m, m), jnp.float32),
            grid_spec=pltpu.PrefetchScalarGridSpec(
                num_scalar_prefetch=0,
                grid=(n_k,),
                # TODO(synk): try pipeline_mode=pl.Buffered(3) for HBM-bound shapes.
                in_specs=[pl.BlockSpec((m, tk), lambda k: (0, k))],
                out_specs=pl.BlockSpec((m, m), lambda k: (0, 0)),
            ),
            compiler_params=pltpu.CompilerParams(
                dimension_semantics=("arbitrary",),
                vmem_limit_bytes=vmem_limit,
            ),
            cost_estimate=pl.CostEstimate(
                flops=2 * m * m * kdim,
                transcendentals=0,
                bytes_accessed=m * kdim * elt_in + m * m * 4,
            ),
        )(feat)
    else:
        # Large-M fallback: 2-D (i, j) output tiling so the accumulator fits VMEM and
        # both v7x TensorCores can share the parallel axes without re-reading the whole slab.
        # TODO(synk): exploit Gram symmetry (compute only j >= i tiles and mirror).
        tm = 512 if m >= 512 else max(8, (m // 8) * 8 or m)
        tn = tm
        tk = _pick_tk(kdim, (tm + tn) * (2 * elt_in + 2), 3 * tm * tn * 4, budget)
        n_i, n_j, n_k = _cdiv(m, tm), _cdiv(m, tn), _cdiv(kdim, tk)
        ragged = (kdim % tk) != 0
        kernel = functools.partial(
            _gram_kernel_tiled, inv_n=inv_n, kdim=kdim, tk=tk,
            compute_dtype=compute_dtype, ragged=ragged)
        out = pl.pallas_call(
            kernel,
            out_shape=jax.ShapeDtypeStruct((m, m), jnp.float32),
            grid_spec=pltpu.PrefetchScalarGridSpec(
                num_scalar_prefetch=0,
                grid=(n_i, n_j, n_k),
                in_specs=[
                    pl.BlockSpec((tm, tk), lambda i, j, k: (i, k)),  # row block
                    pl.BlockSpec((tn, tk), lambda i, j, k: (j, k)),  # column block
                ],
                out_specs=pl.BlockSpec((tm, tn), lambda i, j, k: (i, j)),
            ),
            compiler_params=pltpu.CompilerParams(
                dimension_semantics=("parallel", "parallel", "arbitrary"),
                vmem_limit_bytes=vmem_limit,
            ),
            cost_estimate=pl.CostEstimate(
                flops=2 * m * m * kdim,
                transcendentals=0,
                bytes_accessed=(n_i + n_j) * m * kdim * elt_in + m * m * 4,
            ),
        )(feat, feat)

    return out.astype(out_dtype)


if __name__ == "__main__":
    key = jax.random.PRNGKey(0)
    a, b, c, d = 2, 4, 16, 16
    x = jax.random.normal(key, (a, b, c, d), dtype=jnp.float32)

    out = jax.block_until_ready(gram(x))

    # Reference check (plain JAX, f32).
    feat = x.reshape(a * b, c * d)
    ref = (feat @ feat.T) / (a * b * c * d)
    assert out.shape == (a * b, a * b)
    assert out.dtype == x.dtype
    # bf16 MXU operands with f32 accumulation -> loosened tolerance vs the f32 reference.
    assert jnp.allclose(out, ref, atol=5e-3, rtol=2e-2)

    print("KERNEL_OK")
</pallas_src>

<mosaic_0001>
module attributes {stable_mosaic.version = 11 : i64} {
  func.func @_gram_kernel_single(%arg0: i32, %arg1: memref<8x256xf32, #tpu.memory_space<vmem>>, %arg2: memref<8x8xf32, #tpu.memory_space<vmem>>) attributes {dimension_semantics = [#tpu.dimension_semantics<arbitrary>], iteration_bounds = array<i64: 1>, scalar_prefetch = 0 : i64, scratch_operands = 0 : i64, tpu.core_type = #tpu.core_type<tc>, window_params = [{transform_indices = @transform_0, window_bounds = array<i64: 8, 256>}, {pipeline_mode = #tpu.pipeline_mode<synchronous>, transform_indices = @transform_1, window_bounds = array<i64: 8, 8>}]} {
    %c0_i32 = arith.constant 0 : i32
    %0 = arith.cmpi eq, %arg0, %c0_i32 : i32
    %1 = arith.extui %0 : i1 to i32
    %c0_i32_0 = arith.constant 0 : i32
    %2 = arith.cmpi ne, %1, %c0_i32_0 : i32
    scf.if %2 {
      %cst_8 = arith.constant 0.000000e+00 : f32
      %12 = vector.broadcast %cst_8 : f32 to vector<8x8xf32>
      %c0_9 = arith.constant 0 : index
      %c0_10 = arith.constant 0 : index
      %13 = vector.load %arg2[%c0_9, %c0_10] : memref<8x8xf32, #tpu.memory_space<vmem>>, vector<8x8xf32>
      tpu.vector_store %arg2[%c0_9, %c0_10], %12 {strides = array<i32>} : memref<8x8xf32, #tpu.memory_space<vmem>>, vector<8x8xf32>,
    } else {
    }
    %c0 = arith.constant 0 : index
    %c0_1 = arith.constant 0 : index
    %3 = vector.load %arg1[%c0, %c0_1] : memref<8x256xf32, #tpu.memory_space<vmem>>, vector<8x256xf32>
    %4 = arith.truncf %3 : vector<8x256xf32> to vector<8x256xbf16>
    %c0_2 = arith.constant 0 : index
    %c0_3 = arith.constant 0 : index
    %5 = vector.load %arg2[%c0_2, %c0_3] : memref<8x8xf32, #tpu.memory_space<vmem>>, vector<8x8xf32>
    %cst = arith.constant dense<0.000000e+00> : vector<8x8xf32>
    %6 = tpu.matmul %4, %4, %cst {dimension_numbers = #tpu.dot_dimension_numbers<[1], [1], [0], [0], [0, 0, 1, 0], [], []>} : vector<8x256xbf16>, vector<8x256xbf16>, vector<8x8xf32> -> vector<8x8xf32>
    %7 = arith.addf %5, %6 : vector<8x8xf32>
    %c0_4 = arith.constant 0 : index
    %c0_5 = arith.constant 0 : index
    %8 = vector.load %arg2[%c0_4, %c0_5] : memref<8x8xf32, #tpu.memory_space<vmem>>, vector<8x8xf32>
    tpu.vector_store %arg2[%c0_4, %c0_5], %7 {strides = array<i32>} : memref<8x8xf32, #tpu.memory_space<vmem>>, vector<8x8xf32>,
    %c0_i32_6 = arith.constant 0 : i32
    %9 = arith.cmpi eq, %arg0, %c0_i32_6 : i32
    %10 = arith.extui %9 : i1 to i32
    %c0_i32_7 = arith.constant 0 : i32
    %11 = arith.cmpi ne, %10, %c0_i32_7 : i32
    scf.if %11 {
      %c0_8 = arith.constant 0 : index
      %c0_9 = arith.constant 0 : index
      %12 = vector.load %arg2[%c0_8, %c0_9] : memref<8x8xf32, #tpu.memory_space<vmem>>, vector<8x8xf32>
      %cst_10 = arith.constant 4.8828125E-4 : f32
      %13 = vector.broadcast %cst_10 : f32 to vector<8x8xf32>
      %14 = arith.mulf %12, %13 : vector<8x8xf32>
      %c0_11 = arith.constant 0 : index
      %c0_12 = arith.constant 0 : index
      %15 = vector.load %arg2[%c0_11, %c0_12] : memref<8x8xf32, #tpu.memory_space<vmem>>, vector<8x8xf32>
      tpu.vector_store %arg2[%c0_11, %c0_12], %14 {strides = array<i32>} : memref<8x8xf32, #tpu.memory_space<vmem>>, vector<8x8xf32>,
    } else {
    }
    return
  }
  func.func @transform_0(%arg0: i32) -> (i32, i32) {
    %c0_i32 = arith.constant 0 : i32
    %c0_i32_0 = arith.constant 0 : i32
    return %c0_i32, %arg0 : i32, i32
  }
  func.func @transform_1(%arg0: i32) -> (i32, i32) {
    %c0_i32 = arith.constant 0 : i32
    %c0_i32_0 = arith.constant 0 : i32
    %c0_i32_1 = arith.constant 0 : i32
    return %c0_i32, %c0_i32_0 : i32, i32
  }
}

</mosaic_0001>

<bundles_post_ra>
// kernel: tpu_custom_call.1
= control target key start
LH: loop header
LB: loop body
LE: loop exit
PB: predicated region body
PF: predicated region fallthrough
CT: control target
= control target key end

     0   :  { %6 = vsyncpa [#allocation3], 0  ;;  %s188_s0 = inlined_call_operand.hbm [shape: f32[8,256], index: 0, kind: input, shape index: {}]   ;;  %s189_s1 = inlined_call_operand.hbm [shape: f32[8,8], index: 1, kind: output, shape index: {}]  }
   0x1   :  { %7 = vsyncpa [#allocation4], 0  ;;  %s148_s6 = smov [#allocation2]   ;;  %s100_s10 = scalar_lea.hbm %s188_s0, 256 }
   0x2   :  { %s14_s7 = sshll.u32 %s148_s6, 4  ;;  %p101_p0 = scmp.ne.s32.totalorder %s188_s0, %s100_s10  ;;  %s15_s7 = int_to_ptr.vmem [resolvable:$true] %s14_s7 }
   0x3   :  { %p104_p1 = scmp.lt.u32.totalorder %s100_s10, %s188_s0 }
   0x5   :  { %p106_p2 = pnand %p104_p1, %p101_p0 }
   0x7   :  { %109 = shalt.err (!%p106_p2)
}
   0x8   :  { %s110_s15 = scalar_lea.vmem %s15_s7, 256  ;;  %p115_p4 = scmp.lt.s32.totalorder %s15_s7, %s15_s7 }
   0x9   :  { %p111_p3 = scmp.ne.s32.totalorder %s15_s7, %s110_s15  ;;  %p116_p5 = scmp.lt.s32.totalorder %s110_s15, %s110_s15 }
   0xb   :  { %p117_p6 = por %p116_p5, %p115_p4 }
   0xd   :  { %p118_p7 = pnand %p117_p6, %p111_p3 }
   0xf   :  { %121 = shalt.err (!%p118_p7)
}
  0x10   :  { %17 = dma.hbm_to_vmem [thread:$0]  %s188_s0, 256, %s15_s7, [#allocation3]  }
  0x11   :  { %144 = dma.done.wait [#allocation3], 256  }
  0x12   :  { %145 = vsyncadd [#allocation3], 4294967040  ;;  %vm26_vm0 = vcmask 64512   ;;  %v149_v0 = vmov 0.0   ;;  %v29_v1 = vld [vmem:[#allocation2 + $0x8] sm:$0xff]  ;;  %v28_v2 = vld [vmem:[#allocation2] sm:$0xff] }
  0x13   :  { %27 = vst.msk [vmem:[#allocation5] sm:$0xff] %vm26_vm0, %v149_v0  ;;  %v31_v3 = vpack.c.bf16 %v29_v1, %v29_v1  ;;  %v30_v4 = vpack.c.bf16 %v28_v2, %v28_v2  ;;  %s150_s0 = smov [#allocation5]  }
  0x14   :  { %s88_s18 = sshll.u32 %s150_s0, 4  ;;  %s89_s18 = int_to_ptr.vmem [resolvable:$true] %s88_s18 }
  0x15   :  { %33 = vmatprep.subr.bf16.mxu0 %v31_v3  ;;  %65 = vmatprep.mubr.bf16.mxu0 %v31_v3  ;;  %s122_s19 = scalar_lea.vmem %s89_s18, 128  ;;  %p127_p9 = scmp.lt.s32.totalorder %s89_s18, %s89_s18 }
  0x16   :  { %34 = vmatpush1.bf16.xpose.msra.mxu0 %v30_v4  ;;  %p123_p8 = scmp.ne.s32.totalorder %s89_s18, %s122_s19  ;;  %p128_p10 = scmp.lt.s32.totalorder %s122_s19, %s122_s19 }
  0x18   :  { %p129_p11 = por %p128_p10, %p127_p9 }
  0x1a   :  { %v32_v5 = vld [vmem:[#allocation5] sm:$0xff]  ;;  %p130_p12 = pnand %p129_p11, %p123_p8 }
  0x1d   :  { %66 = vmatmul.mubr.bf16.vlgmr.msra.gmra.mrb[0].mxu0 %v30_v4 }
  0xf0   :  { %v67_v6 = vpop.f32.mrb[0].mxu0 }
  0xf1   :  { %v73_v7 = vadd.f32 %v67_v6, %v32_v5  ;;  %v69_v8 = vpop.f32.mrb[1].mxu0 }
  0xf2   :  { %v70_v9 = vpop.f32.mrb[2].mxu0 }
  0xf3   :  { %75 = vst.msk [vmem:[#allocation5] sm:$0xff] %vm26_vm0, %v73_v7  ;;  %v71_v10 = vpop.f32.mrb[3].mxu0 }
  0xfa   :  { %v79_v11 = vld [vmem:[#allocation5] sm:$0xff] }
  0xfb   :  { %v80_v12 = vmul.f32 0.00048828125, %v79_v11 }
  0xfd   :  { %81 = vst.msk [vmem:[#allocation5] sm:$0xff] %vm26_vm0, %v80_v12 }
  0xfe   :  { %133 = shalt.err (!%p130_p12)
}
  0xff   :  { %s134_s22 = scalar_lea.hbm %s189_s1, 128 }
 0x100   :  { %p135_p13 = scmp.ne.s32.totalorder %s189_s1, %s134_s22  ;;  %p138_p0 = scmp.lt.u32.totalorder %s134_s22, %s189_s1 }
 0x102   :  { %p140_p1 = pnand %p138_p0, %p135_p13 }
 0x104   :  { %143 = shalt.err (!%p140_p1)
}
 0x105   :  { %91 = dma.vmem_to_hbm [thread:$0]  %s89_s18, 128, %s189_s1, [#allocation4]  }
 0x106   :  { %146 = dma.done.wait [#allocation4], 128  }
 0x107   :  { %147 = vsyncadd [#allocation4], 4294967168 }
 0x108   :  { %95 = vsyncpa [#allocation3], 1 }
 0x109   :  { %96 = vsyncpa [#allocation4], 1 }

</bundles_post_ra>
